<compile_context>
chip_gen: v6e
topology: v6e:2x2x1
jax: 0.10.0
libtpu: 0.0.40
codegen_flags: <defaults>
</compile_context>

<pallas_src>
import functools
import math

import jax
import jax.numpy as jnp
from jax import lax
from jax.experimental import pallas as pl
from jax.experimental.pallas import tpu as pltpu


_VMEM_LIMIT_BYTES = 48 * 1024 * 1024  # safe on every gen (v7x physical VMEM/core = 64 MiB)
# TODO(synk): with trusted chip detection, raise to ~96 MiB on v5e/v6e (128 MiB VMEM).


# --------------------------------------------------------------------------- #
# Kernels
# --------------------------------------------------------------------------- #
def _l2_normalize_row_kernel(x_ref, o_ref):
    """One vector per row: normalize each (tm, D) row to unit L2 norm."""
    x = x_ref[...].astype(jnp.float32)                      # (tm, D)
    ss = jnp.sum(x * x, axis=-1, keepdims=True)             # (tm, 1), exact f32
    o_ref[...] = (x * lax.rsqrt(ss)).astype(o_ref.dtype)    # rsqrt -> EUP slot


def _l2_normalize_packed_kernel(x_ref, o_ref, *, seg_width, roll_is_numpy):
    """Each 128-lane row packs 128 // seg_width independent vectors.

    Segmented all-reduce of the squares via a log2(seg_width)-stage XOR
    butterfly: per stage, two lane rotations (XLU) + one select + one add
    (VPU).  After the last stage every lane holds its own segment's sum of
    squares (exact f32 tree sum).  Rows never mix, so garbage rows in a
    partial tail block stay confined to their own (discarded) output rows.
    """
    x = x_ref[...].astype(jnp.float32)                      # (tm, 128)
    lanes = x.shape[-1]
    lane = lax.broadcasted_iota(jnp.int32, x.shape, 1)
    acc = x * x
    s = 1
    while s < seg_width:                                    # static, unrolled
        plus_shift = lanes - s if roll_is_numpy else s      # fetch from lane l + s
        minus_shift = s if roll_is_numpy else lanes - s     # fetch from lane l - s
        plus = pltpu.roll(acc, plus_shift, 1)
        minus = pltpu.roll(acc, minus_shift, 1)
        # Lane l pairs with lane (l XOR s); the pairing never crosses a
        # seg_width-aligned boundary, so segments stay independent.
        acc = acc + jnp.where((lane & s) == 0, plus, minus)
        s *= 2
    o_ref[...] = (x * lax.rsqrt(acc)).astype(o_ref.dtype)


# --------------------------------------------------------------------------- #
# Host-side helpers
# --------------------------------------------------------------------------- #
@functools.lru_cache(maxsize=None)
def _probe_roll_direction():
    """Probe pltpu.roll's rotation convention once per process.

    Returns True if roll(x, n - s, axis=-1)[l] == x[(l + s) % n] (np.roll
    convention), False if it rotates the other way, None if the probe fails
    (caller then falls back to the unpacked path).
    """
    def probe_kernel(x_ref, o_ref):
        o_ref[...] = pltpu.roll(x_ref[...], 127, 1)

    try:
        x = jnp.broadcast_to(jnp.arange(128, dtype=jnp.float32), (8, 128))
        y = pl.pallas_call(
            probe_kernel,
            out_shape=jax.ShapeDtypeStruct((8, 128), jnp.float32),
        )(x)
        v = float(y[0, 0])
    except Exception:
        return None
    if v == 1.0:
        return True
    if v == 127.0:
        return False
    return None


@functools.lru_cache(maxsize=None)
def _num_tensorcores_per_chip() -> int:
    """Best-effort TensorCores per chip: v5e/v6e -> 1, v4/v5p/v7x -> 2."""
    try:
        kind = jax.devices()[0].device_kind.lower()
    except Exception:
        return 2
    if "lite" in kind or "v5e" in kind or "v6e" in kind:
        return 1
    return 2


def _round_up(a: int, m: int) -> int:
    return (a + m - 1) // m * m


def _choose_row_tile(rows: int, lane_width: int, itemsize: int, num_cores: int) -> int:
    """Large row tile (multiple of 8), sized against the real VMEM footprint,
    balanced so the tail block is nearly full, and with a step count that is a
    multiple of the TensorCore count on multi-TC chips."""
    # Footprint per tile element: 2x double-buffered in + out pipeline buffers
    # in the native dtype, plus ~5 live full-tile f32/i32 temporaries inside
    # the kernel (f32 upcast, squares accumulator, lane iota, rotated copies).
    bytes_per_elem = 4 * itemsize + 5 * 4
    budget = int(_VMEM_LIMIT_BYTES * 0.70)          # headroom for compiler scratch
    tm = budget // (lane_width * bytes_per_elem)
    tm = max(8, min(tm, 16384) // 8 * 8)
    # TODO(synk): tile the feature dim as well when D is so large that even an
    # 8-row block exceeds the VMEM budget.
    rows8 = _round_up(rows, 8)
    tm = min(tm, rows8)
    nsteps = pl.cdiv(rows, tm)
    if num_cores > 1 and rows8 >= 8 * num_cores:
        # v7x (and v4/v5p megacore): even step count so the "parallel" grid
        # axis splits across both TensorCores.  Single-TC v5e/v6e skip this.
        nsteps = _round_up(nsteps, num_cores)
    tm = _round_up(pl.cdiv(rows, nsteps), 8)
    if tm >= rows:
        tm = rows                                   # one full-extent block
    return tm


# --------------------------------------------------------------------------- #
# Public entry point
# --------------------------------------------------------------------------- #
def normalize(x: jax.Array) -> jax.Array:
    """x / ||x||_2 along the last dim (keepdim broadcast), as a Pallas TPU kernel."""
    orig_shape = x.shape
    if x.ndim == 0:
        raise ValueError("normalize expects at least one dimension")
    if x.size == 0:
        return x

    D = orig_shape[-1]
    R = math.prod(orig_shape[:-1])
    x2d = x.reshape(R, D)
    itemsize = jnp.dtype(x.dtype).itemsize

    # Lane-dense packing: fold G = 128 // D rows into one 128-lane packed row
    # via a free row-major reshape so loads/stores are full-width vregs.
    roll_is_numpy = None
    if D < 128 and 128 % D == 0:
        G = 128 // D
        roll_is_numpy = _probe_roll_direction()
        if roll_is_numpy is None:      # pltpu.roll unusable -> unpacked fallback
            G = 1
    else:
        # D >= 128 is already (nearly) lane-dense.  D < 128 not dividing 128
        # falls back to a (tm, D) block: identical HBM traffic, only in-VMEM
        # loads/stores are partially masked.
        # TODO(synk): sublane-pack general D < 128 to recover full lane density
        # without the extra HBM pass a host-side feature pad would cost.
        G = 1
    L = G * D

    Rp = R
    if G > 1 and R % G:
        # Rare ragged remainder: pad < G rows with ones (finite norms, rows
        # discarded afterwards).  The common divisible case does no pad and no
        # output slice -- no extra HBM passes.
        pad_rows = G - R % G
        x2d = jnp.pad(x2d, ((0, pad_rows), (0, 0)), constant_values=1)
        Rp = R + pad_rows
    rows = Rp // G
    xp = x2d.reshape(rows, L)          # contiguous row-major reshape: free

    num_cores = _num_tensorcores_per_chip()
    tm = _choose_row_tile(rows, L, itemsize, num_cores)
    # Partial tail block (rows % tm != 0) is handled in-kernel: the reduction
    # is per-row, and Pallas discards the out-of-bounds output rows.
    grid = (pl.cdiv(rows, tm),)

    if G > 1:
        kernel = functools.partial(
            _l2_normalize_packed_kernel, seg_width=D, roll_is_numpy=roll_is_numpy
        )
    else:
        kernel = _l2_normalize_row_kernel

    out_packed = pl.pallas_call(
        kernel,
        out_shape=jax.ShapeDtypeStruct((rows, L), x.dtype),
        grid_spec=pltpu.PrefetchScalarGridSpec(
            num_scalar_prefetch=0,
            grid=grid,
            in_specs=[pl.BlockSpec((tm, L), lambda i: (i, 0))],
            out_specs=pl.BlockSpec((tm, L), lambda i: (i, 0)),
        ),
        compiler_params=pltpu.CompilerParams(
            dimension_semantics=("parallel",),
            vmem_limit_bytes=_VMEM_LIMIT_BYTES,
        ),
        cost_estimate=pl.CostEstimate(
            flops=3 * R * D,
            transcendentals=R,
            bytes_accessed=2 * R * D * itemsize,
        ),
    )(xp)

    out2d = out_packed.reshape(Rp, D)
    if Rp != R:
        out2d = out2d[:R]
    return out2d.reshape(orig_shape)


if __name__ == "__main__":
    key = jax.random.PRNGKey(0)
    # Small NCHW-like tensor; the last dim (W = 32) is the normalization axis.
    x = jax.random.normal(key, (2, 4, 16, 32), dtype=jnp.float32)

    out = jax.block_until_ready(normalize(x))

    # Reference: same semantics as the torch module (no epsilon).
    ref = x / jnp.linalg.norm(x, axis=-1, keepdims=True)
    assert out.shape == x.shape and out.dtype == x.dtype
    assert jnp.allclose(out, ref, atol=1e-5, rtol=1e-5)

    print("KERNEL_OK")
</pallas_src>

<mosaic_0001>
module attributes {stable_mosaic.version = 11 : i64} {
  func.func @probe_kernel(%arg0: memref<8x128xf32, #tpu.memory_space<vmem>>, %arg1: memref<8x128xf32, #tpu.memory_space<vmem>>) attributes {dimension_semantics = [], scalar_prefetch = 0 : i64, scratch_operands = 0 : i64, tpu.core_type = #tpu.core_type<tc>} {
    %c0 = arith.constant 0 : index
    %c0_0 = arith.constant 0 : index
    %0 = vector.load %arg0[%c0, %c0_0] : memref<8x128xf32, #tpu.memory_space<vmem>>, vector<8x128xf32>
    %c127_i32 = arith.constant 127 : i32
    %1 = tpu.dynamic_rotate %0 by %c127_i32 dim 1 : vector<8x128xf32>, i32 -> vector<8x128xf32>
    %c0_1 = arith.constant 0 : index
    %c0_2 = arith.constant 0 : index
    %2 = vector.load %arg1[%c0_1, %c0_2] : memref<8x128xf32, #tpu.memory_space<vmem>>, vector<8x128xf32>
    tpu.vector_store %arg1[%c0_1, %c0_2], %1 {strides = array<i32>} : memref<8x128xf32, #tpu.memory_space<vmem>>, vector<8x128xf32>,
    return
  }
}

module attributes {stable_mosaic.version = 11 : i64} {
  func.func @_l2_normalize_row_kernel(%arg0: i32, %arg1: memref<64x32xf32, #tpu.memory_space<vmem>>, %arg2: memref<64x32xf32, #tpu.memory_space<vmem>>) attributes {dimension_semantics = [#tpu.dimension_semantics<parallel>], iteration_bounds = array<i64: 2>, scalar_prefetch = 0 : i64, scratch_operands = 0 : i64, tpu.core_type = #tpu.core_type<tc>, window_params = [{transform_indices = @transform_0, window_bounds = array<i64: 64, 32>}, {transform_indices = @transform_1, window_bounds = array<i64: 64, 32>}]} {
    %c0 = arith.constant 0 : index
    %c0_0 = arith.constant 0 : index
    %0 = vector.load %arg1[%c0, %c0_0] : memref<64x32xf32, #tpu.memory_space<vmem>>, vector<64x32xf32>
    %1 = arith.mulf %0, %0 : vector<64x32xf32>
    %cst = arith.constant dense<0.000000e+00> : vector<64xf32>
    %2 = vector.multi_reduction <add>, %1, %cst [1] : vector<64x32xf32> to vector<64xf32>
    %3 = vector.shape_cast %2 : vector<64xf32> to vector<64x1xf32>
    %4 = math.rsqrt %3 : vector<64x1xf32>
    %5 = vector.broadcast %4 : vector<64x1xf32> to vector<64x32xf32>
    %6 = arith.mulf %0, %5 : vector<64x32xf32>
    %c0_1 = arith.constant 0 : index
    %c0_2 = arith.constant 0 : index
    %7 = vector.load %arg2[%c0_1, %c0_2] : memref<64x32xf32, #tpu.memory_space<vmem>>, vector<64x32xf32>
    tpu.vector_store %arg2[%c0_1, %c0_2], %6 {strides = array<i32>} : memref<64x32xf32, #tpu.memory_space<vmem>>, vector<64x32xf32>,
    return
  }
  func.func @transform_0(%arg0: i32) -> (i32, i32) {
    %c0_i32 = arith.constant 0 : i32
    %c0_i32_0 = arith.constant 0 : i32
    return %arg0, %c0_i32 : i32, i32
  }
  func.func @transform_1(%arg0: i32) -> (i32, i32) {
    %c0_i32 = arith.constant 0 : i32
    %c0_i32_0 = arith.constant 0 : i32
    return %arg0, %c0_i32 : i32, i32
  }
}

</mosaic_0001>

<bundles_post_ra>
// kernel: tpu_custom_call.1
= control target key start
LH: loop header
LB: loop body
LE: loop exit
PB: predicated region body
PF: predicated region fallthrough
CT: control target
= control target key end

     0   :  { %6 = vsyncpa [#allocation3], 0  ;;  %s106_s0 = inlined_call_operand.hbm [shape: f32[8,128], index: 0, kind: input, shape index: {}]   ;;  %s107_s1 = inlined_call_operand.hbm [shape: f32[8,128], index: 1, kind: output, shape index: {}]  }
   0x1   :  { %7 = vsyncpa [#allocation4], 0  ;;  %s87_s6 = smov [#allocation2]  }
   0x2   :  { %s14_s7 = sshll.u32 %s87_s6, 4  ;;  %s15_s7 = int_to_ptr.vmem [resolvable:$true] %s14_s7 }
   0x3   :  { %s51_s8 = scalar_lea.vmem %s15_s7, 128  ;;  %p56_p1 = scmp.lt.s32.totalorder %s15_s7, %s15_s7 }
   0x4   :  { %p52_p0 = scmp.ne.s32.totalorder %s15_s7, %s51_s8  ;;  %p57_p2 = scmp.lt.s32.totalorder %s51_s8, %s51_s8 }
   0x6   :  { %p58_p3 = por %p57_p2, %p56_p1 }
   0x8   :  { %p59_p4 = pnand %p58_p3, %p52_p0 }
   0xa   :  { %62 = shalt.err (!%p59_p4)
}
   0xb   :  { %17 = dma.hbm_to_vmem [thread:$0]  %s106_s0, 128, %s15_s7, [#allocation3]  }
   0xc   :  { %83 = dma.done.wait [#allocation3], 128  }
   0xd   :  { %84 = vsyncadd [#allocation3], 4294967168  ;;  %v21_v0 = vld [vmem:[#allocation2] sm:$0xff]  ;;  %s88_s11 = smov 127   ;;  %s89_s12 = smov [#allocation5]  }
   0xe   :  { %22 = vrot.lane.b32.xlu0 %v21_v0, %s88_s11  ;;  %s31_s13 = sshll.u32 %s89_s12, 4  ;;  %s32_s13 = int_to_ptr.vmem [resolvable:$true] %s31_s13 }
   0xf   :  { %s63_s14 = scalar_lea.vmem %s32_s13, 128  ;;  %p68_p6 = scmp.lt.s32.totalorder %s32_s13, %s32_s13 }
  0x10   :  { %p64_p5 = scmp.ne.s32.totalorder %s32_s13, %s63_s14  ;;  %p69_p7 = scmp.lt.s32.totalorder %s63_s14, %s63_s14 }
  0x12   :  { %p70_p8 = por %p69_p7, %p68_p6 }
  0x14   :  { %p71_p9 = pnand %p70_p8, %p64_p5 }
  0x80   :  { %v23_v1 = vpop.permute.xlu0 %22 }
  0x81   :  { %24 = vst [vmem:[#allocation5] sm:$0xff] %v23_v1 }
  0x82   :  { %74 = shalt.err (!%p71_p9)
}
  0x83   :  { %34 = dma.vmem_to_hbm [thread:$0]  %s32_s13, 128, %s107_s1, [#allocation4]  }
  0x84   :  { %85 = dma.done.wait [#allocation4], 128  }
  0x85   :  { %86 = vsyncadd [#allocation4], 4294967168 }
  0x86   :  { %38 = vsyncpa [#allocation3], 1 }
  0x87   :  { %39 = vsyncpa [#allocation4], 1 }

// kernel: tpu_custom_call.1
= control target key start
LH: loop header
LB: loop body
LE: loop exit
PB: predicated region body
PF: predicated region fallthrough
CT: control target
= control target key end

     0   :  { %s294_s6 = smov 0   ;;  %s334_s0 = inlined_call_operand.vmem [shape: f32[128,32], index: 0, kind: input, shape index: {}]   ;;  %s335_s1 = inlined_call_operand.vmem [shape: f32[128,32], index: 1, kind: output, shape index: {}]  }
   0x1 LB: > { %s241_s7 = sadd.s32 4294967295, %s282_s6   ;;  %p245_p0 = scmp.ge.s32.totalorder %s282_s6, 1  ;;  %s282_s6 = sphi %s294_s6, %s11_s6  }
   0x2   : > { %p88_p1 = scmp.lt.s32.totalorder %s282_s6, 3 }
   0x4   : > { %p89_p2 = pnand %p245_p0, %p88_p1 }
   0x5   : > { %s246_s8 = sshll.u32 (!%p89_p2), %s241_s7, 3 }
   0x6   : > { %92 = sbr.rel (%p89_p2) target bundleno = 186 (0xba), region = 24  ;;  %p109_p3 = scmp.lt.s32.totalorder (!%p89_p2), %s246_s8, 15 }
   0xb   : > { %s337_s8 = smov (!%p109_p3, %s246_s8), 15  ;;  %vm136_vm0 = vcmask 261120  }
   0xc   : > { %s247_s9 = sshll.u32 %s337_s8, 3 }
   0xd   : > { %s112_s12 = scalar_lea.vmem %s334_s0, %s247_s9  ;;  %s118_s15 = scalar_lea.vmem %s335_s1, %s247_s9 }
   0xe   : > { %v122_v0 = vld [vmem:[%s112_s12 + $0x10] sm:$0xff]  ;;  %v120_v1 = vld [vmem:[%s112_s12] sm:$0xff]  ;;  %v123_v2 = vld [vmem:[%s112_s12 + $0x18] sm:$0xff] }
   0xf   : > { %v130_v3 = vmul.f32 %v122_v0, %v122_v0  ;;  %v128_v4 = vmul.f32 %v120_v1, %v120_v1  ;;  %v131_v5 = vmul.f32 %v123_v2, %v123_v2  ;;  %v121_v6 = vld [vmem:[%s112_s12 + $0x8] sm:$0xff]  ;;  %v124_v9 = vld [vmem:[%s112_s12 + $0x20] sm:$0xff]  ;;  %v127_v16 = vld [vmem:[%s112_s12 + $0x38] sm:$0xff] }
  0x10   : > { %v129_v7 = vmul.f32 %v121_v6, %v121_v6  ;;  %v125_v8 = vld [vmem:[%s112_s12 + $0x28] sm:$0xff]  ;;  %v132_v15 = vmul.f32 %v124_v9, %v124_v9  ;;  %v126_v17 = vld [vmem:[%s112_s12 + $0x30] sm:$0xff]  ;;  %v135_v20 = vmul.f32 %v127_v16, %v127_v16 }
  0x11   : > { %v143_v10 = vsel %vm136_vm0, %v130_v3, 0.0  ;;  %v137_v11 = vsel %vm136_vm0, %v128_v4, 0.0  ;;  %v146_v12 = vsel %vm136_vm0, %v131_v5, 0.0  ;;  %v133_v14 = vmul.f32 %v125_v8, %v125_v8 }
  0x12   : > { %144 = vadd.xlane.f32.xlu1 %v143_v10  ;;  %138 = vadd.xlane.f32.xlu0 %v137_v11  ;;  %v140_v13 = vsel %vm136_vm0, %v129_v7, 0.0  ;;  %v149_v19 = vsel %vm136_vm0, %v132_v15, 0.0  ;;  %v134_v21 = vmul.f32 %v126_v17, %v126_v17  ;;  %v158_v22 = vsel %vm136_vm0, %v135_v20, 0.0 }
  0x13   : > { %v152_v18 = vsel %vm136_vm0, %v133_v14, 0.0 }
  0x14   : > { %v155_v23 = vsel %vm136_vm0, %v134_v21, 0.0 }
  0x16   : > { %147 = vadd.xlane.f32.xlu1 %v146_v12  ;;  %141 = vadd.xlane.f32.xlu0 %v140_v13 }
  0x1a   : > { %153 = vadd.xlane.f32.xlu1 %v152_v18  ;;  %150 = vadd.xlane.f32.xlu0 %v149_v19 }
  0x1e   : > { %159 = vadd.xlane.f32.xlu1 %v158_v22  ;;  %156 = vadd.xlane.f32.xlu0 %v155_v23 }
  0x9b   : > { %v145_v24 = vpop.xlane.xlu1 %144  ;;  %v139_v25 = vpop.xlane.xlu0 %138 }
  0x9c   : > { %260 = vrsqrt.f32 %v145_v24 }
  0x9d   : > { %262 = vrsqrt.f32 %v139_v25 }
  0x9f   : > { %v148_v26 = vpop.xlane.xlu1 %147  ;;  %v142_v27 = vpop.xlane.xlu0 %141 }
  0xa0   : > { %264 = vrsqrt.f32 %v148_v26 }
  0xa1   : > { %266 = vrsqrt.f32 %v142_v27 }
  0xa3   : > { %v154_v28 = vpop.xlane.xlu1 %153  ;;  %v151_v29 = vpop.xlane.xlu0 %150 }
  0xa4   : > { %268 = vrsqrt.f32 %v154_v28 }
  0xa5   : > { %270 = vrsqrt.f32 %v151_v29 }
  0xa7   : > { %v160_v30 = vpop.xlane.xlu1 %159  ;;  %v157_v31 = vpop.xlane.xlu0 %156 }
  0xa8   : > { %272 = vrsqrt.f32 %v160_v30 }
  0xa9   : > { %v261_v32 = vpop.eup %260  ;;  %274 = vrsqrt.f32 %v157_v31 }
  0xaa   : > { %v263_v33 = vpop.eup %262  ;;  %v171_v34 = vmul.f32 %v261_v32, %v122_v0 }
  0xab   : > { %v169_v35 = vmul.f32 %v263_v33, %v120_v1 }
  0xac   : > { %179 = vst.msk [vmem:[%s118_s15 + $0x10] sm:$0xff] %vm136_vm0, %v171_v34 }
  0xad   : > { %v265_v36 = vpop.eup %264  ;;  %177 = vst.msk [vmem:[%s118_s15] sm:$0xff] %vm136_vm0, %v169_v35 }
  0xae   : > { %v267_v37 = vpop.eup %266  ;;  %v172_v38 = vmul.f32 %v265_v36, %v123_v2 }
  0xaf   : > { %v170_v39 = vmul.f32 %v267_v37, %v121_v6 }
  0xb0   : > { %180 = vst.msk [vmem:[%s118_s15 + $0x18] sm:$0xff] %vm136_vm0, %v172_v38 }
  0xb1   : > { %v269_v40 = vpop.eup %268  ;;  %178 = vst.msk [vmem:[%s118_s15 + $0x8] sm:$0xff] %vm136_vm0, %v170_v39 }
  0xb2   : > { %v271_v41 = vpop.eup %270  ;;  %v174_v42 = vmul.f32 %v269_v40, %v125_v8 }
  0xb3   : > { %v173_v43 = vmul.f32 %v271_v41, %v124_v9 }
  0xb4   : > { %182 = vst.msk [vmem:[%s118_s15 + $0x28] sm:$0xff] %vm136_vm0, %v174_v42 }
  0xb5   : > { %v273_v44 = vpop.eup %272  ;;  %181 = vst.msk [vmem:[%s118_s15 + $0x20] sm:$0xff] %vm136_vm0, %v173_v43 }
  0xb6   : > { %v275_v45 = vpop.eup %274  ;;  %v176_v46 = vmul.f32 %v273_v44, %v127_v16 }
  0xb7   : > { %v175_v47 = vmul.f32 %v275_v45, %v126_v17 }
  0xb8   : > { %184 = vst.msk [vmem:[%s118_s15 + $0x38] sm:$0xff] %vm136_vm0, %v176_v46 }
  0xb9   : > { %183 = vst.msk [vmem:[%s118_s15 + $0x30] sm:$0xff] %vm136_vm0, %v175_v47 }
  0xba PF: > { %s11_s6 = sadd.s32 1, %s282_s6  }
  0xbb   : > { %p8_p4 = scmp.ge.s32.totalorder %s11_s6, 4  }
  0xbd   :  { %10 = sbr.rel (!%p8_p4) target bundleno = 1 (0x1), region = 54 }

</bundles_post_ra>
